<compile_context>
chip_gen: v6e
topology: v6e:2x2x1
jax: 0.10.0
libtpu: 0.0.40
codegen_flags: <defaults>
</compile_context>

<pallas_src>
import math
import functools

import jax
import jax.numpy as jnp
from jax.experimental import pallas as pl
from jax.experimental.pallas import tpu as pltpu


# ----------------------------- kernels --------------------------------------

def _pe_add_kernel(x_ref, pe_ref, o_ref):
    # x_ref: (ts, tb, D);  pe_ref: (ts, 1, D) -> broadcasts over batch.
    pe = pe_ref[...].astype(x_ref.dtype)          # in-kernel cast (free on VPU)
    o_ref[...] = (x_ref[...] + pe).astype(o_ref.dtype)


def _pe_add_dropout_hw_kernel(seed_ref, x_ref, pe_ref, o_ref, *,
                              keep_thresh, scale):
    # Training-mode inverted dropout using the TPU hardware PRNG.
    # Seed mixed with both grid indices -> independent per-tile streams.
    pltpu.prng_seed(seed_ref[0], pl.program_id(0), pl.program_id(1))
    y = x_ref[...] + pe_ref[...].astype(x_ref.dtype)
    bits = pltpu.prng_random_bits(y.shape)
    if bits.dtype != jnp.int32:
        bits = pltpu.bitcast(bits, jnp.int32)
    # bits uniform over int32; P(bits < keep_thresh) == p  => drop.
    keep = bits >= jnp.int32(keep_thresh)
    o_ref[...] = jnp.where(keep, y * jnp.asarray(scale, y.dtype),
                           jnp.zeros_like(y)).astype(o_ref.dtype)


def _pe_add_dropout_bits_kernel(x_ref, pe_ref, bits_ref, o_ref, *,
                                keep_thresh, scale):
    # Portable dropout path (TEST-ONLY, non-TPU backends): bits precomputed
    # with jax.random and streamed from HBM (extra 4 B/elem of traffic).
    y = x_ref[...] + pe_ref[...].astype(x_ref.dtype)
    keep = bits_ref[...] >= jnp.int32(keep_thresh)
    o_ref[...] = jnp.where(keep, y * jnp.asarray(scale, y.dtype),
                           jnp.zeros_like(y)).astype(o_ref.dtype)


# ----------------------------- wrapper ---------------------------------------

def make_positional_encoding_table(d_model: int, max_len: int = 5000,
                                   dtype=jnp.float32):
    """Same construction as the PyTorch __init__ (deterministic, no params)."""
    position = jnp.arange(max_len, dtype=jnp.float32)[:, None]          # (L, 1)
    div_term = jnp.exp(jnp.arange(0, d_model, 2, dtype=jnp.float32)
                       * (-math.log(10000.0) / d_model))                # (D/2,)
    pe = jnp.zeros((max_len, 1, d_model), dtype=jnp.float32)
    pe = pe.at[:, 0, 0::2].set(jnp.sin(position * div_term))
    pe = pe.at[:, 0, 1::2].set(jnp.cos(position * div_term))
    return pe.astype(dtype)


def _choose_tiles(S, B, D, itemsize,
                  target_bytes=2 << 20,        # ~2 MiB x-blocks (pipeline sweet spot)
                  max_block_bytes=4 << 20):    # hard cap per block (v7x VMEM guard)
    """Pick (tile_seq, tile_b) so one (tile_seq, tile_b, D) block is ~2 MiB,
    never exceeds max_block_bytes, and the seq grid has >= 2 steps when S > 1
    (keeps both v7x TensorCores busy under "parallel" semantics)."""
    row_bytes = max(1, B * D * itemsize)                 # one seq position
    if row_bytes > max_block_bytes:
        # A single seq row is too big: tile the batch dim as well.
        tile_seq = 1
        tile_b = max(1, max_block_bytes // max(1, D * itemsize))
        if tile_b >= 8:
            tile_b = (tile_b // 8) * 8                   # sublane-friendly
        tile_b = int(min(B, tile_b))
    else:
        tile_b = B
        tile_seq = int(max(1, min(S, target_bytes // row_bytes)))
        # Keep at least 2 seq blocks so a degenerate 1-block grid doesn't idle
        # one of v7x's two TensorCores.
        if tile_seq >= S and S > 1:
            tile_seq = int(pl.cdiv(S, 2))
    return tile_seq, tile_b


def positional_encoding(x, pe, *, dropout_p: float = 0.1,
                        training: bool = False, seed: int = 0,
                        tile_seq: int | None = None,
                        tile_b: int | None = None,
                        use_hw_prng: bool | None = None):
    """x: [S, B, D], pe: [max_len, 1, D] -> [S, B, D] = dropout(x + pe[:S])."""
    S, B, D = x.shape
    assert pe.shape[0] >= S and pe.shape[1] == 1 and pe.shape[2] == D

    itemsize = jnp.dtype(x.dtype).itemsize
    auto_ts, auto_tb = _choose_tiles(S, B, D, itemsize)
    tile_seq = int(max(1, min(S, tile_seq if tile_seq is not None else auto_ts)))
    tile_b = int(max(1, min(B, tile_b if tile_b is not None else auto_tb)))

    grid = (pl.cdiv(S, tile_seq), pl.cdiv(B, tile_b))    # masked tails OK

    # pe is passed as the original [max_len, 1, D] buffer; the BlockSpec windows
    # the first S rows (no wrapper-side slice/cast materialization).
    x_spec = pl.BlockSpec((tile_seq, tile_b, D), lambda i, j: (i, j, 0))
    pe_spec = pl.BlockSpec((tile_seq, 1, D), lambda i, j: (i, 0, 0))
    out_spec = pl.BlockSpec((tile_seq, tile_b, D), lambda i, j: (i, j, 0))
    out_shape = jax.ShapeDtypeStruct((S, B, D), x.dtype)

    cparams = pltpu.CompilerParams(
        dimension_semantics=("parallel", "parallel"),    # independent tiles
        vmem_limit_bytes=32 * 1024 * 1024,               # explicit (v5e default is 16 MiB)
    )

    if (not training) or dropout_p == 0.0:
        return pl.pallas_call(
            _pe_add_kernel,
            out_shape=out_shape,
            grid=grid,
            in_specs=[x_spec, pe_spec],
            out_specs=out_spec,
            compiler_params=cparams,
        )(x, pe)

    p = float(dropout_p)
    # Drop iff int32 bits < keep_thresh, where P(bits < t) = (t + 2^31) / 2^32.
    keep_thresh = int(round(p * 4294967296.0)) - 2147483648
    keep_thresh = max(-2147483648, min(2147483647, keep_thresh))
    scale = 1.0 / (1.0 - p)

    if use_hw_prng is None:
        use_hw_prng = (jax.default_backend() == "tpu")

    if use_hw_prng:
        seed_arr = jnp.asarray([seed], dtype=jnp.int32)
        return pl.pallas_call(
            functools.partial(_pe_add_dropout_hw_kernel,
                              keep_thresh=keep_thresh, scale=scale),
            out_shape=out_shape,
            grid=grid,
            in_specs=[pl.BlockSpec(memory_space=pltpu.MemorySpace.SMEM),
                      x_spec, pe_spec],
            out_specs=out_spec,
            compiler_params=cparams,
        )(seed_arr, x, pe)

    # Portable fallback (TEST-ONLY): never run this on TPU — it streams an extra
    # int32 per element from HBM (~1.5-2x total traffic).
    if jax.default_backend() == "tpu":
        raise RuntimeError(
            "positional_encoding: the precomputed-bits dropout path is a "
            "non-TPU test fallback; use the hardware-PRNG path on TPU.")
    key = jax.random.PRNGKey(seed)
    bits = jax.lax.bitcast_convert_type(
        jax.random.bits(key, (S, B, D), dtype=jnp.uint32), jnp.int32)
    bits_spec = pl.BlockSpec((tile_seq, tile_b, D), lambda i, j: (i, j, 0))
    return pl.pallas_call(
        functools.partial(_pe_add_dropout_bits_kernel,
                          keep_thresh=keep_thresh, scale=scale),
        out_shape=out_shape,
        grid=grid,
        in_specs=[x_spec, pe_spec, bits_spec],
        out_specs=out_spec,
        compiler_params=cparams,
    )(x, pe, bits)


# ----------------------------- demo / test -----------------------------------

if __name__ == "__main__":
    # Small shapes; d_model=128 keeps the lane dim dense (full vector stores).
    seq_len, batch, d_model = 8, 2, 128
    max_len = 64

    key = jax.random.PRNGKey(0)
    x = jax.random.normal(key, (seq_len, batch, d_model), dtype=jnp.float32)
    pe = make_positional_encoding_table(d_model, max_len=max_len)

    ref = x + pe[:seq_len]                               # broadcast over batch

    # Eval mode (dropout is identity) — deterministic, check against reference.
    out_eval = positional_encoding(x, pe, dropout_p=0.1, training=False)
    out_eval = jax.block_until_ready(out_eval)
    assert out_eval.shape == (seq_len, batch, d_model)
    assert jnp.allclose(out_eval, ref, atol=1e-6, rtol=1e-6)

    # Training mode — dropout mask bits differ from PyTorch's RNG; semantics
    # (inverted dropout with probability p, scale 1/(1-p)) match.
    out_train = positional_encoding(x, pe, dropout_p=0.1, training=True, seed=42)
    out_train = jax.block_until_ready(out_train)
    assert out_train.shape == (seq_len, batch, d_model)
    assert bool(jnp.all(jnp.isfinite(out_train)))
    # Kept elements are scaled by 1/(1-p); dropped elements are exactly 0.
    kept = out_train != 0.0
    assert jnp.allclose(jnp.where(kept, out_train, 0.0),
                        jnp.where(kept, ref / (1.0 - 0.1), 0.0),
                        atol=1e-5, rtol=1e-5)

    print("KERNEL_OK")
</pallas_src>

<mosaic_0001>
module attributes {stable_mosaic.version = 11 : i64} {
  func.func @_pe_add_kernel(%arg0: i32, %arg1: i32, %arg2: memref<4x2x128xf32, #tpu.memory_space<vmem>>, %arg3: memref<4x1x128xf32, #tpu.memory_space<vmem>>, %arg4: memref<4x2x128xf32, #tpu.memory_space<vmem>>) attributes {dimension_semantics = [#tpu.dimension_semantics<parallel>, #tpu.dimension_semantics<parallel>], iteration_bounds = array<i64: 2, 1>, scalar_prefetch = 0 : i64, scratch_operands = 0 : i64, tpu.core_type = #tpu.core_type<tc>, window_params = [{transform_indices = @transform_0, window_bounds = array<i64: 4, 2, 128>}, {transform_indices = @transform_1, window_bounds = array<i64: 4, 1, 128>}, {transform_indices = @transform_2, window_bounds = array<i64: 4, 2, 128>}]} {
    %c0 = arith.constant 0 : index
    %c0_0 = arith.constant 0 : index
    %c0_1 = arith.constant 0 : index
    %0 = vector.load %arg3[%c0, %c0_0, %c0_1] : memref<4x1x128xf32, #tpu.memory_space<vmem>>, vector<4x1x128xf32>
    %c0_2 = arith.constant 0 : index
    %c0_3 = arith.constant 0 : index
    %c0_4 = arith.constant 0 : index
    %1 = vector.load %arg2[%c0_2, %c0_3, %c0_4] : memref<4x2x128xf32, #tpu.memory_space<vmem>>, vector<4x2x128xf32>
    %2 = vector.broadcast %0 : vector<4x1x128xf32> to vector<4x2x128xf32>
    %3 = arith.addf %1, %2 : vector<4x2x128xf32>
    %c0_5 = arith.constant 0 : index
    %c0_6 = arith.constant 0 : index
    %c0_7 = arith.constant 0 : index
    %4 = vector.load %arg4[%c0_5, %c0_6, %c0_7] : memref<4x2x128xf32, #tpu.memory_space<vmem>>, vector<4x2x128xf32>
    tpu.vector_store %arg4[%c0_5, %c0_6, %c0_7], %3 {strides = array<i32>} : memref<4x2x128xf32, #tpu.memory_space<vmem>>, vector<4x2x128xf32>,
    return
  }
  func.func @transform_0(%arg0: i32, %arg1: i32) -> (i32, i32, i32) {
    %c0_i32 = arith.constant 0 : i32
    %c0_i32_0 = arith.constant 0 : i32
    return %arg0, %arg1, %c0_i32 : i32, i32, i32
  }
  func.func @transform_1(%arg0: i32, %arg1: i32) -> (i32, i32, i32) {
    %c0_i32 = arith.constant 0 : i32
    %c0_i32_0 = arith.constant 0 : i32
    %c0_i32_1 = arith.constant 0 : i32
    return %arg0, %c0_i32, %c0_i32_0 : i32, i32, i32
  }
  func.func @transform_2(%arg0: i32, %arg1: i32) -> (i32, i32, i32) {
    %c0_i32 = arith.constant 0 : i32
    %c0_i32_0 = arith.constant 0 : i32
    return %arg0, %arg1, %c0_i32 : i32, i32, i32
  }
}

</mosaic_0001>

<bundles_post_ra>
// kernel: tpu_custom_call.1
= control target key start
LH: loop header
LB: loop body
LE: loop exit
PB: predicated region body
PF: predicated region fallthrough
CT: control target
= control target key end

     0   :  { %7 = vsyncpa [#allocation3], 0  ;;  %s826_s0 = inlined_call_operand.hbm [shape: f32[8,2,128], index: 0, kind: input, shape index: {}]   ;;  %s827_s1 = inlined_call_operand.hbm [shape: f32[64,1,128], index: 1, kind: input, shape index: {}]   ;;  %s828_s2 = inlined_call_operand.hbm [shape: f32[8,2,128], index: 2, kind: output, shape index: {}]  }
   0x1   :  { %9 = vsyncpa [#allocation3 + $0x1], 0 }
   0x2   :  { %10 = vsyncpa [#allocation6], 0 }
   0x3   :  { %12 = vsyncpa [#allocation6 + $0x1], 0 }
   0x4   :  { %13 = vsyncpa [#allocation4], 0 }
   0x5   :  { %15 = vsyncpa [#allocation4 + $0x1], 0  ;;  %s650_s9 = smov 0   ;;  %s652_s10 = smov 0  }
   0x6   :  { %s654_s11 = smov 0   ;;  %s656_s12 = smov 0  }
   0x7   :  { %s658_s13 = smov 0   ;;  %s660_s14 = smov 0  }
   0x8 LB: > { %s385_s15 = sadd.s32 4294967295, %s624_s14   ;;  %s386_s16 = sadd.s32 4294967294, %s624_s14   ;;  %s624_s14 = sphi %s660_s14, %s21_s14   ;;  %s620_s13 = sphi %s658_s13, %s839_s13   ;;  %s616_s12 = sphi %s656_s12, %s838_s12   ;;  %s612_s11 = sphi %s654_s11, %s837_s11   ;;  %s608_s10 = sphi %s652_s10, %s836_s10   ;;  %s604_s9 = sphi %s650_s9, %s835_s9  }
   0x9   : > { %s33_s17 = sadd.s32 1, %s620_s13  ;;  %s42_s18 = sadd.s32 1, %s612_s11 }
   0xa   : > { %p35_p0 = scmp.ge.s32.totalorder %s33_s17, 2  ;;  %p49_p1 = scmp.ne.s32.totalorder %s612_s11, %s608_s10 }
   0xb   : > { %p50_p2 = scmp.eq.s32.totalorder %s624_s14, 0  ;;  %p55_p3 = scmp.ne.s32.totalorder %s608_s10, %s604_s9 }
   0xc   : > { %s841_s17 = smov (%p35_p0, %s33_s17), 0  ;;  %p56_p5 = scmp.eq.s32.totalorder %s385_s15, 0 }
   0xd   : > { %p691_p4 = por %p50_p2, %p49_p1  ;;  %s37_s20 = ssub.s32 %s620_s13, %s841_s17 }
   0xe   : > { %p107_p6 = scmp.eq.s32.totalorder %s385_s15, 1  ;;  %p40_p7 = scmp.eq.s32.totalorder %s37_s20, 0 }
   0xf   : > { %p697_p8 = por %p56_p5, %p55_p3  ;;  %p113_p10 = scmp.eq.s32.totalorder %s386_s16, 1 }
  0x10   : > { %p701_p9 = por %p107_p6, %p49_p1  ;;  %p388_p12 = scmp.ge.s32.totalorder %s624_s14, 2 }
  0x11   : > { %s706_s23 = scalar_select %p40_p7, %s612_s11, %s42_s18  }
  0x12   : > { %p708_p11 = por %p113_p10, %p55_p3  ;;  %p428_p13 = scmp.lt.s32.totalorder %s624_s14, 2 }
  0x13   : > { %s715_s25 = sand.u32 1, %s612_s11   ;;  %s408_s27 = sshll.u32 %s620_s13, 7 }
  0x14   : > { %s389_s26 = sshll.u32 %s715_s25, 3  ;;  %s144_s30 = scalar_lea.hbm %s826_s0, %s408_s27 }
  0x15   : > { %s137_s3 = scalar_lea.vmem [#allocation2], %s389_s26  ;;  %p724_p0 = pnand %p428_p13, %p691_p4 }
  0x16   : > { %s145_s4 = sshll.u32 %s137_s3, 4  ;;  %p395_p1 = scmp.ge.s32.totalorder %s624_s14, 1  ;;  %s146_s4 = int_to_ptr.vmem [resolvable:$true] %s145_s4 }
  0x17   : > { %s134_s6 = scalar_lea.sflag [#allocation3], %s715_s25  ;;  %p486_p2 = pneg %p724_p0 }
  0x18   : > { %s497_s7 = scalar_lea.vmem %s146_s4, 128  ;;  %s626_s8 = smov [#allocation2]  }
  0x19   : > { %p498_p3 = scmp.ne.s32.totalorder %s146_s4, %s497_s7  ;;  %s502_s15 = sshll.u32 %s626_s8, 4  ;;  %s503_s15 = int_to_ptr.vmem [resolvable:$false] %s502_s15 }
  0x1a   : > { %s504_s16 = scalar_lea.vmem %s503_s15, 256  ;;  %p505_p4 = scmp.lt.s32.totalorder %s146_s4, %s503_s15 }
  0x1b   : > { %p500_p5 = pnand %p498_p3, %p486_p2  ;;  %p506_p7 = scmp.lt.s32.totalorder %s504_s16, %s497_s7 }
  0x1d   : > { %p501_p6 = pneg %p500_p5  ;;  %p507_p10 = por %p506_p7, %p505_p4 }
  0x1f   : > { %p508_p13 = pnand %p507_p10, %p501_p6 }
  0x21   : > { %511 = shalt.err (!%p508_p13)
}
  0x22   : > { %s627_s18 = smov 32   ;;  %s628_s19 = smov 2  }
  0x23   : > { %420 = dma.hbm_to_vmem [thread:$0]  (!%p724_p0), %s144_s30, 128, %s146_s4, %s134_s6, %s627_s18, %s627_s18, %s628_s19  }
  0x24   : > { %p174_p3 = scmp.lt.s32.totalorder %s624_s14, 3  ;;  %s392_s20 = sshll.u32 %s715_s25, 2 }
  0x25   : > { %s409_s26 = sshll.u32 %s620_s13, 6  ;;  %s159_s7 = scalar_lea.vmem [#allocation5], %s392_s20 }
  0x26   : > { %p742_p5 = pnand %p395_p1, %p174_p3  ;;  %s165_s3 = scalar_lea.hbm %s827_s1, %s409_s26 }
  0x27   : > { %s166_s8 = sshll.u32 %s159_s7, 4  ;;  %s156_s15 = scalar_lea.sflag [#allocation6], %s715_s25  ;;  %s167_s8 = int_to_ptr.vmem [resolvable:$true] %s166_s8 }
  0x28   : > { %s525_s16 = scalar_lea.vmem %s167_s8, 64  ;;  %s629_s30 = smov [#allocation5]  }
  0x29   : > { %p526_p6 = scmp.ne.s32.totalorder %s167_s8, %s525_s16  ;;  %s530_s4 = sshll.u32 %s629_s30, 4  ;;  %s531_s4 = int_to_ptr.vmem [resolvable:$false] %s530_s4 }
  0x2a   : > { %s532_s6 = scalar_lea.vmem %s531_s4, 128  ;;  %p533_p1 = scmp.lt.s32.totalorder %s167_s8, %s531_s4 }
  0x2b   : > { %p528_p4 = pnand %p526_p6, %p486_p2  ;;  %p534_p10 = scmp.lt.s32.totalorder %s532_s6, %s525_s16 }
  0x2d   : > { %p529_p7 = pneg %p528_p4  ;;  %p535_p13 = por %p534_p10, %p533_p1 }
  0x2f   : > { %p536_p3 = pnand %p535_p13, %p529_p7 }
  0x31   : > { %539 = shalt.err (!%p536_p3)
}
  0x32   : > { %s630_s18 = smov 16   ;;  %s631_s19 = smov 1  }
  0x33   : > { %423 = dma.hbm_to_vmem [thread:$0]  (!%p724_p0), %s165_s3, 64, %s167_s8, %s156_s15, %s630_s18, %s630_s18, %s631_s19  }
  0x34   : > { %178 = sbr.rel (%p742_p5) target bundleno = 87 (0x57), region = 28  ;;  %s758_s25 = sand.u32 (!%p742_p5), 1, %s608_s10  }
  0x35   : > { %s396_s20 = sshll.u32 (!%p742_p5), %s758_s25, 3  ;;  %s181_s26 = scalar_lea.sflag (!%p742_p5), [#allocation3], %s758_s25 }
  0x36   : > { %s184_s28 = scalar_lea.vmem (!%p742_p5), [#allocation2], %s396_s20 }
  0x39   : > { %591 = dma.done.wait (%p697_p8), %s181_s26, 128  }
  0x3a   : > { %593 = vsyncadd (%p697_p8), %s181_s26, 4294967168  ;;  %s397_s5 = sshll.u32 %s758_s25, 2  ;;  %s190_s27 = scalar_lea.sflag [#allocation6], %s758_s25 }
  0x3b   : > { %s193_s29 = scalar_lea.vmem [#allocation5], %s397_s5 }
  0x3c   : > { %595 = dma.done.wait (%p697_p8), %s190_s27, 64  }
  0x3d   : > { %597 = vsyncadd (%p697_p8), %s190_s27, 4294967232  ;;  %s218_s3 = scalar_lea.vmem [#allocation7], %s396_s20  ;;  %s410_s8 = sshll.u32 %s616_s12, 7  ;;  %v399_v0 = vld [vmem:[%s193_s29] ss:$0 sm:$0xff] }
  0x3e   : > { %s277_s7 = sshll.u32 %s218_s3, 4  ;;  %v226_v1 = vld [vmem:[%s184_s28] sm:$0x3]  ;;  %v400_v2 = vld [vmem:[%s193_s29 + $0x1] ss:$0 sm:$0xff]  ;;  %s778_s12 = scalar_lea.hbm %s828_s2, %s410_s8  ;;  %s773_s7 = int_to_ptr.vmem [resolvable:$true] %s277_s7 }
  0x3f   : > { %v254_v3 = vadd.f32 %v399_v0, %v226_v1  ;;  %v227_v4 = vld [vmem:[%s184_s28 + $0x2] sm:$0x3]  ;;  %v401_v5 = vld [vmem:[%s193_s29 + $0x2] ss:$0 sm:$0xff]  ;;  %v228_v6 = vld [vmem:[%s184_s28 + $0x4] sm:$0x3] }
  0x40   : > { %v255_v7 = vadd.f32 %v400_v2, %v227_v4  ;;  %v256_v8 = vadd.f32 %v401_v5, %v228_v6  ;;  %v402_v9 = vld [vmem:[%s193_s29 + $0x3] ss:$0 sm:$0xff]  ;;  %v229_v10 = vld [vmem:[%s184_s28 + $0x6] sm:$0x3]  ;;  %s263_s16 = scalar_lea.sflag [#allocation4], %s758_s25  ;;  %s540_s30 = scalar_lea.vmem %s773_s7, 128 }
  0x41   : > { %258 = vst [vmem:[%s218_s3] sm:$0x3] %v254_v3  ;;  %v257_v11 = vadd.f32 %v402_v9, %v229_v10  ;;  %p541_p8 = scmp.ne.s32.totalorder %s773_s7, %s540_s30  ;;  %s632_s4 = smov [#allocation7]  }
  0x42   : > { %259 = vst [vmem:[%s218_s3 + $0x2] sm:$0x3] %v255_v7  ;;  %260 = vst [vmem:[%s218_s3 + $0x4] sm:$0x3] %v256_v8  ;;  %s544_s6 = sshll.u32 %s632_s4, 4  ;;  %s545_s6 = int_to_ptr.vmem [resolvable:$false] %s544_s6 }
  0x43   : > { %261 = vst [vmem:[%s218_s3 + $0x6] sm:$0x3] %v257_v11  ;;  %p542_p0 = pnand %p541_p8, %p701_p9  ;;  %s546_s18 = scalar_lea.vmem %s545_s6, 256 }
  0x44   : > { %p547_p5 = scmp.lt.s32.totalorder %s773_s7, %s545_s6  ;;  %p548_p6 = scmp.lt.s32.totalorder %s546_s18, %s540_s30 }
  0x45   : > { %p543_p2 = pneg %p542_p0 }
  0x46   : > { %p549_p4 = por %p548_p6, %p547_p5 }
  0x48   : > { %p550_p7 = pnand %p549_p4, %p543_p2 }
  0x4a   : > { %553 = shalt.err (!%p550_p7)
}
  0x4b   : > { %s554_s19 = scalar_lea.hbm %s778_s12, 128  ;;  %s558_s28 = scalar_lea.hbm %s828_s2, 256 }
  0x4c   : > { %p555_p1 = scmp.ne.s32.totalorder %s778_s12, %s554_s19  ;;  %p559_p3 = scmp.lt.s32.totalorder %s778_s12, %s828_s2 }
  0x4d   : > { %p560_p8 = scmp.lt.s32.totalorder %s558_s28, %s554_s19 }
  0x4e   : > { %p556_p10 = pnand %p555_p1, %p701_p9 }
  0x4f   : > { %p561_p0 = por %p560_p8, %p559_p3 }
  0x50   : > { %p557_p13 = pneg %p556_p10 }
  0x52   : > { %p562_p2 = pnand %p561_p0, %p557_p13 }
  0x54   : > { %565 = shalt.err (!%p562_p2)
}
  0x55   : > { %s633_s29 = smov 32   ;;  %s634_s3 = smov 2  }
  0x56   : > { %415 = dma.vmem_to_hbm [thread:$0]  (%p701_p9), %s773_s7, 128, %s778_s12, %s263_s16, %s633_s29, %s633_s29, %s634_s3  }
  0x57 PF: > { %s292_s8 = sand.u32 1, %s604_s9   ;;  %p425_p5 = pnand %p388_p12, %p708_p11 }
  0x58   : > { %s293_s21 = scalar_lea.sflag [#allocation4], %s292_s8 }
  0x59   : > { %p426_p6 = pneg %p425_p5 }
  0x5b   : > { %599 = dma.done.wait (%p426_p6), %s293_s21, 128  }
  0x5c   : > { %601 = vsyncadd (%p426_p6), %s293_s21, 4294967168  ;;  %s21_s14 = sadd.s32 1, %s624_s14   ;;  %s835_s9 = smov %s608_s10 }
  0x5d   : > { %p18_p4 = scmp.ge.s32.totalorder %s21_s14, 4   ;;  %s836_s10 = smov %s612_s11 }
  0x5e   : > { %s837_s11 = smov %s706_s23  ;;  %s838_s12 = smov %s620_s13 }
  0x5f   : > { %s839_s13 = smov %s841_s17  ;;  %20 = sbr.rel (!%p18_p4) target bundleno = 8 (0x8), region = 86 }
  0x64   :  { %298 = vsyncpa [#allocation3], 1 }
  0x65   :  { %300 = vsyncpa [#allocation3 + $0x1], 1 }
  0x66   :  { %301 = vsyncpa [#allocation6], 1 }
  0x67   :  { %303 = vsyncpa [#allocation6 + $0x1], 1 }
  0x68   :  { %304 = vsyncpa [#allocation4], 1 }
  0x69   :  { %306 = vsyncpa [#allocation4 + $0x1], 1 }

</bundles_post_ra>
